<compile_context>
chip_gen: v6e
topology: v6e:2x2x1
jax: 0.10.0
libtpu: 0.0.40
codegen_flags: <defaults>
</compile_context>

<pallas_src>
import jax
import jax.numpy as jnp
from jax.experimental import pallas as pl
from jax.experimental.pallas import tpu as pltpu

IN_FEATURES = 16
HIDDEN = 16
OUT_FEATURES = 8

PACK = 8                        # samples packed per 128-lane row (8 * 16 = 128)
SUBLANE = 8                     # f32 sublane tile
ROW_QUANT = PACK * SUBLANE      # 64-row tile quantum -> packed sublane dim % 8 == 0

PACKED_IN = PACK * IN_FEATURES      # 128 lanes
PACKED_HID = PACK * HIDDEN          # 128 lanes
PACKED_OUT = PACK * OUT_FEATURES    # 64 lanes (full last dim of the output slab)


def _round_up(n, m):
    return (n + m - 1) // m * m


def toy_mlp_kernel(x_ref, w1_ref, b1_ref, w2_ref, b2_ref, o_ref):
    # x : (TB/8, 128)  packed activations (8 samples per row)
    # w1: (128, 128)   block-diagonal (8 copies of W1^T)      b1: (1, 128) f32
    # w2: (128, 64)    block-diagonal (8 copies of W2^T)      b2: (1, 64)  f32
    # o : (TB/8, 64)   packed output (8 samples per row) -- no in-kernel relayout
    x = x_ref[...]
    h = jnp.dot(x, w1_ref[...], preferred_element_type=jnp.float32) + b1_ref[...]
    h = jnp.maximum(h, 0.0)                      # ReLU (f32 on the VPU)
    h = h.astype(w2_ref.dtype)                   # back to weight dtype for the MXU
    y = jnp.dot(h, w2_ref[...], preferred_element_type=jnp.float32) + b2_ref[...]
    o_ref[...] = y.astype(o_ref.dtype)


def prepare_toy_model_params(w1, b1, w2, b2, dtype=jnp.float32):
    """One-time layout prep from PyTorch ((out,in) weights, 1-D biases).

    Builds lane-dense block-diagonal weights so the kernel consumes/produces
    packed (.., 128)/(.., 64) slabs.  Hoisted out of the per-call path.
    Pass dtype=jnp.bfloat16 for the bandwidth-saving bf16 path (f32 accumulate).
    """
    w1_t = jnp.asarray(w1).T.astype(jnp.float32)   # (16, 16)
    w2_t = jnp.asarray(w2).T.astype(jnp.float32)   # (16, 8)
    eye = jnp.eye(PACK, dtype=jnp.float32)
    w1_bd = jnp.kron(eye, w1_t).astype(dtype)                    # (128, 128)
    w2_bd = jnp.kron(eye, w2_t).astype(dtype)                    # (128, 64)
    b1_bd = jnp.tile(jnp.asarray(b1).reshape(-1), (PACK,)).reshape(1, -1)  # (1,128) f32
    b2_bd = jnp.tile(jnp.asarray(b2).reshape(-1), (PACK,)).reshape(1, -1)  # (1, 64) f32
    return (w1_bd, b1_bd.astype(jnp.float32), w2_bd, b2_bd.astype(jnp.float32))


def _choose_tiling(B, tb):
    """Pick (tb_eff, b_pad): tile rows and padded batch.

    - tiles are multiples of 64 rows (packed sublane dim % 8 == 0), unless a
      single block covers the whole (8-row padded) batch;
    - at least 2 grid steps whenever B allows it (v7x megacore sharding);
    - padding kept small by dividing B as evenly as possible over the steps.
    """
    tb = max(ROW_QUANT, _round_up(int(tb), ROW_QUANT))
    B = int(B)
    if B <= ROW_QUANT:
        b_pad = _round_up(B, PACK)            # one full-array block (always legal)
        return b_pad, b_pad
    steps = max(2, -(-B // tb))               # >=2 so both v7x TCs get work
    tb_eff = _round_up(-(-B // steps), ROW_QUANT)
    b_pad = steps * tb_eff
    return tb_eff, b_pad


def toy_model_forward(x, params, *, tb=16384):
    """x: (B, 16) -> (B, 8). `params` from prepare_toy_model_params."""
    w1_bd, b1_bd, w2_bd, b2_bd = params
    B = x.shape[0]
    assert x.shape[1] == IN_FEATURES

    tb_eff, b_pad = _choose_tiling(B, tb)
    if b_pad != B:
        x = jnp.pad(x, ((0, b_pad - B), (0, 0)))
    # Cast at the HBM boundary (no-op for the f32 default), then pack lane-dense.
    x = x.astype(w1_bd.dtype)
    x_packed = x.reshape(b_pad // PACK, PACKED_IN)        # free row-major view

    rows = tb_eff // PACK                                  # packed rows per step
    grid = (b_pad // tb_eff,)

    in_bytes = b_pad * IN_FEATURES * jnp.dtype(w1_bd.dtype).itemsize
    out_bytes = b_pad * OUT_FEATURES * 4
    wgt_bytes = (w1_bd.size + w2_bd.size) * jnp.dtype(w1_bd.dtype).itemsize \
        + (b1_bd.size + b2_bd.size) * 4
    flops = 2 * (b_pad // PACK) * (PACKED_IN * PACKED_HID + PACKED_HID * PACKED_OUT)

    out = pl.pallas_call(
        toy_mlp_kernel,
        out_shape=jax.ShapeDtypeStruct((b_pad // PACK, PACKED_OUT), jnp.float32),
        grid=grid,
        in_specs=[
            pl.BlockSpec((rows, PACKED_IN), lambda i: (i, 0)),           # x: streamed
            pl.BlockSpec((PACKED_IN, PACKED_HID), lambda i: (0, 0)),     # W1bd: resident
            pl.BlockSpec((1, PACKED_HID), lambda i: (0, 0)),             # b1: resident
            pl.BlockSpec((PACKED_HID, PACKED_OUT), lambda i: (0, 0)),    # W2bd: resident
            pl.BlockSpec((1, PACKED_OUT), lambda i: (0, 0)),             # b2: resident
        ],
        out_specs=pl.BlockSpec((rows, PACKED_OUT), lambda i: (i, 0)),
        compiler_params=pltpu.CompilerParams(
            dimension_semantics=("parallel",),
            vmem_limit_bytes=32 * 1024 * 1024,
        ),
        cost_estimate=pl.CostEstimate(
            flops=flops, transcendentals=0,
            bytes_accessed=in_bytes + out_bytes + wgt_bytes),
    )(x_packed, w1_bd, b1_bd, w2_bd, b2_bd)

    y = out.reshape(b_pad, OUT_FEATURES)                   # free row-major view
    return y[:B] if b_pad != B else y


if __name__ == "__main__":
    key = jax.random.PRNGKey(0)
    kx, kw1, kb1, kw2, kb2 = jax.random.split(key, 5)

    B = 8
    x = jax.random.normal(kx, (B, IN_FEATURES), dtype=jnp.float32)

    # Deterministic parameter init (PyTorch nn.Linear layout: (out, in)).
    bound1 = 1.0 / jnp.sqrt(float(IN_FEATURES))
    w1 = jax.random.uniform(kw1, (HIDDEN, IN_FEATURES), minval=-bound1,
                            maxval=bound1, dtype=jnp.float32)
    b1 = jax.random.uniform(kb1, (HIDDEN,), minval=-bound1, maxval=bound1,
                            dtype=jnp.float32)
    bound2 = 1.0 / jnp.sqrt(float(HIDDEN))
    w2 = jax.random.uniform(kw2, (OUT_FEATURES, HIDDEN), minval=-bound2,
                            maxval=bound2, dtype=jnp.float32)
    b2 = jax.random.uniform(kb2, (OUT_FEATURES,), minval=-bound2, maxval=bound2,
                            dtype=jnp.float32)

    ref_fn = lambda xx: jnp.maximum(xx @ w1.T + b1, 0.0) @ w2.T + b2

    # One-time layout prep (not in the per-call path), f32 default.
    params = prepare_toy_model_params(w1, b1, w2, b2)

    # Small batch (single full block).
    out = jax.block_until_ready(toy_model_forward(x, params))
    assert out.shape == (B, OUT_FEATURES)
    assert jnp.allclose(out, ref_fn(x), atol=1e-5, rtol=1e-5)

    # Larger, non-divisible batch exercising the padded multi-step grid.
    B2 = 300
    x2 = jax.random.normal(kx, (B2, IN_FEATURES), dtype=jnp.float32)
    out2 = jax.block_until_ready(toy_model_forward(x2, params, tb=256))
    assert out2.shape == (B2, OUT_FEATURES)
    assert jnp.allclose(out2, ref_fn(x2), atol=1e-5, rtol=1e-5)

    # bf16 fast path (halved HBM input traffic, f32 accumulation).
    params_bf16 = prepare_toy_model_params(w1, b1, w2, b2, dtype=jnp.bfloat16)
    out3 = jax.block_until_ready(toy_model_forward(x2, params_bf16, tb=256))
    assert out3.shape == (B2, OUT_FEATURES)
    assert jnp.allclose(out3, ref_fn(x2), atol=5e-2, rtol=5e-2)

    print("KERNEL_OK")
</pallas_src>

<mosaic_0001>
module attributes {stable_mosaic.version = 11 : i64} {
  func.func @toy_mlp_kernel(%arg0: i32, %arg1: memref<1x128xf32, #tpu.memory_space<vmem>>, %arg2: memref<128x128xf32, #tpu.memory_space<vmem>>, %arg3: memref<1x128xf32, #tpu.memory_space<vmem>>, %arg4: memref<128x64xf32, #tpu.memory_space<vmem>>, %arg5: memref<1x64xf32, #tpu.memory_space<vmem>>, %arg6: memref<1x64xf32, #tpu.memory_space<vmem>>) attributes {dimension_semantics = [#tpu.dimension_semantics<parallel>], iteration_bounds = array<i64: 1>, scalar_prefetch = 0 : i64, scratch_operands = 0 : i64, tpu.core_type = #tpu.core_type<tc>, window_params = [{transform_indices = @transform_0, window_bounds = array<i64: 1, 128>}, {pipeline_mode = #tpu.pipeline_mode<synchronous>, transform_indices = @transform_1, window_bounds = array<i64: 128, 128>}, {pipeline_mode = #tpu.pipeline_mode<synchronous>, transform_indices = @transform_2, window_bounds = array<i64: 1, 128>}, {pipeline_mode = #tpu.pipeline_mode<synchronous>, transform_indices = @transform_3, window_bounds = array<i64: 128, 64>}, {pipeline_mode = #tpu.pipeline_mode<synchronous>, transform_indices = @transform_4, window_bounds = array<i64: 1, 64>}, {transform_indices = @transform_5, window_bounds = array<i64: 1, 64>}]} {
    %c0 = arith.constant 0 : index
    %c0_0 = arith.constant 0 : index
    %0 = vector.load %arg1[%c0, %c0_0] : memref<1x128xf32, #tpu.memory_space<vmem>>, vector<1x128xf32>
    %c0_1 = arith.constant 0 : index
    %c0_2 = arith.constant 0 : index
    %1 = vector.load %arg2[%c0_1, %c0_2] : memref<128x128xf32, #tpu.memory_space<vmem>>, vector<128x128xf32>
    %cst = arith.constant dense<0.000000e+00> : vector<1x128xf32>
    %2 = tpu.matmul %0, %1, %cst {dimension_numbers = #tpu.dot_dimension_numbers<[1], [0], [0], [1], [0, 0, 1, 1], [], []>} : vector<1x128xf32>, vector<128x128xf32>, vector<1x128xf32> -> vector<1x128xf32>
    %c0_3 = arith.constant 0 : index
    %c0_4 = arith.constant 0 : index
    %3 = vector.load %arg3[%c0_3, %c0_4] : memref<1x128xf32, #tpu.memory_space<vmem>>, vector<1x128xf32>
    %4 = arith.addf %2, %3 : vector<1x128xf32>
    %cst_5 = arith.constant 0.000000e+00 : f32
    %5 = vector.broadcast %cst_5 : f32 to vector<1x128xf32>
    %6 = arith.maximumf %4, %5 : vector<1x128xf32>
    %c0_6 = arith.constant 0 : index
    %c0_7 = arith.constant 0 : index
    %7 = vector.load %arg4[%c0_6, %c0_7] : memref<128x64xf32, #tpu.memory_space<vmem>>, vector<128x64xf32>
    %cst_8 = arith.constant dense<0.000000e+00> : vector<1x64xf32>
    %8 = tpu.matmul %6, %7, %cst_8 {dimension_numbers = #tpu.dot_dimension_numbers<[1], [0], [0], [1], [0, 0, 1, 1], [], []>} : vector<1x128xf32>, vector<128x64xf32>, vector<1x64xf32> -> vector<1x64xf32>
    %c0_9 = arith.constant 0 : index
    %c0_10 = arith.constant 0 : index
    %9 = vector.load %arg5[%c0_9, %c0_10] : memref<1x64xf32, #tpu.memory_space<vmem>>, vector<1x64xf32>
    %10 = arith.addf %8, %9 : vector<1x64xf32>
    %c0_11 = arith.constant 0 : index
    %c0_12 = arith.constant 0 : index
    %11 = vector.load %arg6[%c0_11, %c0_12] : memref<1x64xf32, #tpu.memory_space<vmem>>, vector<1x64xf32>
    tpu.vector_store %arg6[%c0_11, %c0_12], %10 {strides = array<i32>} : memref<1x64xf32, #tpu.memory_space<vmem>>, vector<1x64xf32>,
    return
  }
  func.func @transform_0(%arg0: i32) -> (i32, i32) {
    %c0_i32 = arith.constant 0 : i32
    %c0_i32_0 = arith.constant 0 : i32
    return %arg0, %c0_i32 : i32, i32
  }
  func.func @transform_1(%arg0: i32) -> (i32, i32) {
    %c0_i32 = arith.constant 0 : i32
    %c0_i32_0 = arith.constant 0 : i32
    %c0_i32_1 = arith.constant 0 : i32
    return %c0_i32, %c0_i32_0 : i32, i32
  }
  func.func @transform_2(%arg0: i32) -> (i32, i32) {
    %c0_i32 = arith.constant 0 : i32
    %c0_i32_0 = arith.constant 0 : i32
    %c0_i32_1 = arith.constant 0 : i32
    return %c0_i32, %c0_i32_0 : i32, i32
  }
  func.func @transform_3(%arg0: i32) -> (i32, i32) {
    %c0_i32 = arith.constant 0 : i32
    %c0_i32_0 = arith.constant 0 : i32
    %c0_i32_1 = arith.constant 0 : i32
    return %c0_i32, %c0_i32_0 : i32, i32
  }
  func.func @transform_4(%arg0: i32) -> (i32, i32) {
    %c0_i32 = arith.constant 0 : i32
    %c0_i32_0 = arith.constant 0 : i32
    %c0_i32_1 = arith.constant 0 : i32
    return %c0_i32, %c0_i32_0 : i32, i32
  }
  func.func @transform_5(%arg0: i32) -> (i32, i32) {
    %c0_i32 = arith.constant 0 : i32
    %c0_i32_0 = arith.constant 0 : i32
    return %arg0, %c0_i32 : i32, i32
  }
}

</mosaic_0001>

<bundles_post_ra>
// kernel: tpu_custom_call.1
= control target key start
LH: loop header
LB: loop body
LE: loop exit
PB: predicated region body
PF: predicated region fallthrough
CT: control target
= control target key end

     0   :  { %v342_v1 = vmov 0.0   ;;  %vm343_vm0 = vmmov 0   ;;  %s517_s0 = inlined_call_operand.vmem [shape: f32[1,128], index: 0, kind: input, shape index: {}]   ;;  %s518_s1 = inlined_call_operand.vmem [shape: f32[128,128], index: 1, kind: input, shape index: {}]   ;;  %s519_s2 = inlined_call_operand.vmem [shape: f32[1,128], index: 2, kind: input, shape index: {}]   ;;  %s520_s3 = inlined_call_operand.vmem [shape: f32[128,64], index: 3, kind: input, shape index: {}]   ;;  %s521_s4 = inlined_call_operand.vmem [shape: f32[1,64], index: 4, kind: input, shape index: {}]   ;;  %s522_s5 = inlined_call_operand.hbm [shape: f32[1,64], index: 5, kind: output, shape index: {}]  }
   0x1   :  { %v37_v0 = vld [vmem:[%s518_s1 + $0x78] sm:$0xff]  ;;  %247 = vmatprep.subr.mxu0 %v342_v1  ;;  %v36_v2 = vld [vmem:[%s518_s1 + $0x70] sm:$0xff]  ;;  %279 = vmatprep.mubr.msk.f32.mxu0 %vm343_vm0, %v342_v1  ;;  %v35_v3 = vld [vmem:[%s518_s1 + $0x68] sm:$0xff] }
   0x2   :  { %248 = vmatpush3.msra.mxu0 %v37_v0  ;;  %282 = vmatprep.subr.mxu1 %v342_v1  ;;  %v34_v4 = vld [vmem:[%s518_s1 + $0x60] sm:$0xff]  ;;  %v125_v5 = vld [vmem:[%s520_s3 + $0x78] sm:$0xff]  ;;  %v124_v6 = vld [vmem:[%s520_s3 + $0x70] sm:$0xff] }
   0x3   :  { %249 = vmatprep.subr.mxu0 %v342_v1  ;;  %314 = vmatprep.mubr.msk.f32.mxu1 %vm343_vm0, %v342_v1  ;;  %v33_v7 = vld [vmem:[%s518_s1 + $0x58] sm:$0xff]  ;;  %v123_v8 = vld [vmem:[%s520_s3 + $0x68] sm:$0xff]  ;;  %v32_v9 = vld [vmem:[%s518_s1 + $0x50] sm:$0xff] }
   0x4   :  { %250 = vmatpush3.msra.mxu0 %v36_v2  ;;  %283 = vmatpush3.msra.mxu1 %v125_v5  ;;  %v122_v10 = vld [vmem:[%s520_s3 + $0x60] sm:$0xff] }
   0x5   :  { %251 = vmatprep.subr.mxu0 %v342_v1  ;;  %284 = vmatprep.subr.mxu1 %v342_v1 }
   0x6   :  { %252 = vmatpush3.msra.mxu0 %v35_v3  ;;  %285 = vmatpush3.msra.mxu1 %v124_v6 }
   0x7   :  { %253 = vmatprep.subr.mxu0 %v342_v1  ;;  %286 = vmatprep.subr.mxu1 %v342_v1 }
   0x8   :  { %254 = vmatpush3.msra.mxu0 %v34_v4  ;;  %287 = vmatpush3.msra.mxu1 %v123_v8 }
   0x9   :  { %255 = vmatprep.subr.mxu0 %v342_v1 }
   0xa   :  { %256 = vmatpush3.msra.mxu0 %v33_v7 }
   0xb   :  { %10 = vsyncpa [#allocation3], 0  ;;  %257 = vmatprep.subr.mxu0 %v342_v1  ;;  %v31_v11 = vld [vmem:[%s518_s1 + $0x48] sm:$0xff]  ;;  %288 = vmatprep.subr.mxu1 %v342_v1  ;;  %v121_v12 = vld [vmem:[%s520_s3 + $0x58] sm:$0xff]  ;;  %s344_s11 = smov [#allocation2]   ;;  %vm197_vm1 = vcmask 516096  }
   0xc   :  { %258 = vmatpush3.msra.mxu0 %v32_v9  ;;  %289 = vmatpush3.msra.mxu1 %v122_v10  ;;  %v30_v13 = vld [vmem:[%s518_s1 + $0x40] sm:$0xff]  ;;  %v120_v14 = vld [vmem:[%s520_s3 + $0x50] sm:$0xff]  ;;  %v29_v15 = vld [vmem:[%s518_s1 + $0x38] sm:$0xff]  ;;  %s205_s12 = sshll.u32 %s344_s11, 4  ;;  %s206_s12 = int_to_ptr.vmem [resolvable:$true] %s205_s12 }
   0xd   :  { %259 = vmatprep.subr.mxu0 %v342_v1  ;;  %290 = vmatprep.subr.mxu1 %v342_v1  ;;  %v119_v16 = vld [vmem:[%s520_s3 + $0x48] sm:$0xff]  ;;  %v28_v17 = vld [vmem:[%s518_s1 + $0x30] sm:$0xff]  ;;  %v118_v18 = vld [vmem:[%s520_s3 + $0x40] sm:$0xff]  ;;  %p325_p1 = scmp.lt.s32.totalorder %s206_s12, %s206_s12 }
   0xe   :  { %260 = vmatpush3.msra.mxu0 %v31_v11  ;;  %291 = vmatpush3.msra.mxu1 %v121_v12  ;;  %v27_v19 = vld [vmem:[%s518_s1 + $0x28] sm:$0xff]  ;;  %v117_v20 = vld [vmem:[%s520_s3 + $0x38] sm:$0xff]  ;;  %v26_v21 = vld [vmem:[%s518_s1 + $0x20] sm:$0xff] }
   0xf   :  { %261 = vmatprep.subr.mxu0 %v342_v1  ;;  %292 = vmatprep.subr.mxu1 %v342_v1  ;;  %v116_v22 = vld [vmem:[%s520_s3 + $0x30] sm:$0xff]  ;;  %v25_v23 = vld [vmem:[%s518_s1 + $0x18] sm:$0xff]  ;;  %v115_v24 = vld [vmem:[%s520_s3 + $0x28] sm:$0xff] }
  0x10   :  { %262 = vmatpush3.msra.mxu0 %v30_v13  ;;  %293 = vmatpush3.msra.mxu1 %v120_v14  ;;  %v24_v25 = vld [vmem:[%s518_s1 + $0x10] sm:$0xff]  ;;  %v114_v26 = vld [vmem:[%s520_s3 + $0x20] sm:$0xff]  ;;  %v23_v27 = vld [vmem:[%s518_s1 + $0x8] sm:$0xff] }
  0x11   :  { %263 = vmatprep.subr.mxu0 %v342_v1  ;;  %294 = vmatprep.subr.mxu1 %v342_v1  ;;  %v113_v28 = vld [vmem:[%s520_s3 + $0x18] sm:$0xff]  ;;  %v22_v29 = vld [vmem:[%s518_s1] sm:$0xff]  ;;  %v112_v31 = vld [vmem:[%s520_s3 + $0x10] sm:$0xff] }
  0x12   :  { %264 = vmatpush3.msra.mxu0 %v29_v15  ;;  %295 = vmatpush3.msra.mxu1 %v119_v16  ;;  %v21_v30 = vld [vmem:[%s517_s0] sm:$0x1]  ;;  %v111_v32 = vld [vmem:[%s520_s3 + $0x8] sm:$0xff] }
  0x13   :  { %265 = vmatprep.subr.mxu0 %v342_v1  ;;  %296 = vmatprep.subr.mxu1 %v342_v1  ;;  %v110_v33 = vld [vmem:[%s520_s3] sm:$0xff]  ;;  %s320_s3 = scalar_lea.vmem %s206_s12, 16 }
  0x14   :  { %266 = vmatpush3.msra.mxu0 %v28_v17  ;;  %297 = vmatpush3.msra.mxu1 %v118_v18  ;;  %v38_v34 = vld [vmem:[%s519_s2] sm:$0x1]  ;;  %p321_p0 = scmp.ne.s32.totalorder %s206_s12, %s320_s3  ;;  %s324_s2 = scalar_lea.vmem %s206_s12, 32 }
  0x15   :  { %267 = vmatprep.subr.mxu0 %v342_v1  ;;  %298 = vmatprep.subr.mxu1 %v342_v1  ;;  %v126_v39 = vld [vmem:[%s521_s4] sm:$0x1]  ;;  %p326_p2 = scmp.lt.s32.totalorder %s324_s2, %s320_s3 }
  0x16   :  { %268 = vmatpush3.msra.mxu0 %v27_v19  ;;  %299 = vmatpush3.msra.mxu1 %v117_v20 }
  0x17   :  { %269 = vmatprep.subr.mxu0 %v342_v1  ;;  %300 = vmatprep.subr.mxu1 %v342_v1  ;;  %p327_p3 = por %p326_p2, %p325_p1 }
  0x18   :  { %270 = vmatpush3.msra.mxu0 %v26_v21  ;;  %301 = vmatpush3.msra.mxu1 %v116_v22 }
  0x19   :  { %271 = vmatprep.subr.mxu0 %v342_v1  ;;  %302 = vmatprep.subr.mxu1 %v342_v1  ;;  %p328_p4 = pnand %p327_p3, %p321_p0 }
  0x1a   :  { %272 = vmatpush3.msra.mxu0 %v25_v23  ;;  %303 = vmatpush3.msra.mxu1 %v115_v24 }
  0x1b   :  { %273 = vmatprep.subr.mxu0 %v342_v1  ;;  %304 = vmatprep.subr.mxu1 %v342_v1 }
  0x1c   :  { %274 = vmatpush3.msra.mxu0 %v24_v25  ;;  %305 = vmatpush3.msra.mxu1 %v114_v26 }
  0x1d   :  { %275 = vmatprep.subr.mxu0 %v342_v1  ;;  %306 = vmatprep.subr.mxu1 %v342_v1 }
  0x1e   :  { %276 = vmatpush3.msra.mxu0 %v23_v27  ;;  %307 = vmatpush3.msra.mxu1 %v113_v28 }
  0x1f   :  { %277 = vmatprep.subr.mxu0 %v342_v1  ;;  %308 = vmatprep.subr.mxu1 %v342_v1 }
  0x20   :  { %278 = vmatpush3.msra.mxu0 %v22_v29  ;;  %309 = vmatpush3.msra.mxu1 %v112_v31 }
  0x21   :  { %280 = vmatmul.mubr.f32.vlgmr.msra.gmra.mxu0 %v21_v30  ;;  %310 = vmatprep.subr.mxu1 %v342_v1 }
  0x22   :  { %311 = vmatpush3.msra.mxu1 %v111_v32 }
  0x23   :  { %312 = vmatprep.subr.mxu1 %v342_v1 }
  0x24   :  { %313 = vmatpush3.msra.mxu1 %v110_v33 }
  0xe1   :  { %v105_v35 = vpop.f32.mrf.mxu0 }
  0xe2   :  { %v106_v36 = vadd.f32 %v105_v35, %v38_v34 }
  0xe3   :  { %v281_v37 = vpop.f32.mrf.mxu0 }
  0xe4   :  { %v109_v38 = vmax.f32 %v106_v36, 0.0 }
  0xe6   :  { %315 = vmatmul.mubr.f32.vlgmr.msra.gmra.mxu1 %v109_v38 }
 0x1a6   :  { %v193_v40 = vpop.f32.mrf.mxu1 }
 0x1a7   :  { %v194_v41 = vadd.f32 %v193_v40, %v126_v39 }
 0x1a8   :  { %v316_v42 = vpop.f32.mrf.mxu1 }
 0x1a9   :  { %198 = vst.msk [vmem:[#allocation2] sm:$0x1] %vm197_vm1, %v194_v41 }
 0x1aa   :  { %331 = shalt.err (!%p328_p4)
}
 0x1ab   :  { %208 = dma.vmem_to_hbm [thread:$0]  %s206_s12, 16, %s522_s5, [#allocation3]  }
 0x1ac   :  { %340 = dma.done.wait [#allocation3], 16  }
 0x1ad   :  { %341 = vsyncadd [#allocation3], 4294967280 }
 0x1ae   :  { %212 = vsyncpa [#allocation3], 1 }

</bundles_post_ra>
